<compile_context>
chip_gen: v6e
topology: v6e:2x2x1
jax: 0.10.0
libtpu: 0.0.40
codegen_flags: <defaults>
</compile_context>

<pallas_src>
import jax
import jax.numpy as jnp
from jax.experimental import pallas as pl
from jax.experimental.pallas import tpu as pltpu


# ---------------------------------------------------------------------------
# Packed-parameter layout constants
# ---------------------------------------------------------------------------
# (f_in, f_out) per Linear layer, in forward order.
DIMS = ((1, 32), (32, 16), (16, 8), (8, 4), (4, 8), (8, 16), (16, 32), (32, 1))

# Layers 1..7 (python idx 0..6): W_j^T (f_out, f_in) stored at rows
# ROW_OFF[j] : ROW_OFF[j]+f_out, cols 0:f_in; bias (f_out,) at col BIAS_COL.
ROW_OFF = (0, 32, 48, 56, 64, 72, 88)     # all 8-aligned (sublane aligned)
BIAS_COL = 32

# Layer 8 (Linear 32->1): weight kept as a COLUMN (32, 1) so the kernel can do
# a VPU multiply + sublane reduce instead of an N=1 MXU matmul.
W8_ROW = 120                               # rows 120:152, col 0
B8_ROW = 152                               # row  152,     col 0
PACK_ROWS = 160                            # multiple of 8
PACK_COLS = 128                            # lane-aligned


# ---------------------------------------------------------------------------
# Kernel: fused 8-layer MLP on one lane-dense batch tile.
#   x_ref : (1, TB)          input samples (batch on lanes)
#   p_ref : (160, 128)       packed weights / biases (resident constant)
#   o_ref : (1, TB)          output samples
# ---------------------------------------------------------------------------
def bombaclat_kernel(x_ref, p_ref, o_ref):
    x = x_ref[...].astype(jnp.float32)                         # (1, TB)

    # ----- layer 1: Linear(1, 32) + ReLU  (K=1 -> VPU outer product) -----
    fi, fo = DIMS[0]
    r = ROW_OFF[0]
    w1 = p_ref[r:r + fo, 0:1]                                  # (32, 1) = W1^T
    b1 = p_ref[r:r + fo, BIAS_COL:BIAS_COL + 1]                # (32, 1)
    h = jnp.maximum(w1 * x + b1, 0.0)                          # (32, TB)

    # ----- layers 2..7: small lane-dense matmuls on the MXU -----
    # ReLU after every layer except layer 4 (encoder output, j == 3).
    for j in range(1, 7):
        fi, fo = DIMS[j]
        r = ROW_OFF[j]
        wt = p_ref[r:r + fo, 0:fi]                             # (fo, fi) = W^T
        b = p_ref[r:r + fo, BIAS_COL:BIAS_COL + 1]             # (fo, 1)
        h = jnp.dot(wt, h, preferred_element_type=jnp.float32) + b
        if j != 3:
            h = jnp.maximum(h, 0.0)                            # (fo, TB)

    # ----- layer 8: Linear(32, 1)  (N=1 -> VPU multiply + sublane reduce) ---
    w8 = p_ref[W8_ROW:W8_ROW + 32, 0:1]                        # (32, 1)
    b8 = p_ref[B8_ROW:B8_ROW + 1, 0:1]                         # (1, 1)
    out = jnp.sum(w8 * h, axis=0, keepdims=True) + b8          # (1, TB)

    o_ref[...] = out.astype(o_ref.dtype)


# ---------------------------------------------------------------------------
# Parameter packing: 16 tiny arrays -> one (160, 128) f32 block.
# params: list of (w, b) with w:(f_in, f_out), b:(1, f_out)  (PyTorch layout).
# ---------------------------------------------------------------------------
def pack_params(params):
    pack = jnp.zeros((PACK_ROWS, PACK_COLS), jnp.float32)
    for j in range(7):
        w, b = params[j]
        fi, fo = DIMS[j]
        r = ROW_OFF[j]
        pack = pack.at[r:r + fo, 0:fi].set(w.T.astype(jnp.float32))
        pack = pack.at[r:r + fo, BIAS_COL].set(
            b.reshape(-1).astype(jnp.float32))
    w8, b8 = params[7]                                          # (32,1), (1,1)
    pack = pack.at[W8_ROW:W8_ROW + 32, 0].set(
        w8.reshape(-1).astype(jnp.float32))
    pack = pack.at[B8_ROW, 0].set(b8.reshape(()).astype(jnp.float32))
    return pack


# ---------------------------------------------------------------------------
# Wrapper: accepts PyTorch-style x of shape (B, 1), returns (B, 1).
# Batch is transposed onto the lane axis, padded to a multiple of the tile.
# ---------------------------------------------------------------------------
def bombaclat_forward(x, params, *, tb=512):
    B = x.shape[0]
    lane = 128

    # Effective batch tile: multiple of 128, no larger than (padded) batch.
    tb_eff = min(tb, pl.cdiv(B, lane) * lane)
    tb_eff = max(lane, (tb_eff // lane) * lane)
    b_pad = pl.cdiv(B, tb_eff) * tb_eff

    # Batch-on-lane layout: (1, B_pad), zero padded.
    xt = jnp.zeros((1, b_pad), x.dtype).at[0, :B].set(x[:, 0])
    pack = pack_params(params)

    grid = (b_pad // tb_eff,)

    out_t = pl.pallas_call(
        bombaclat_kernel,
        out_shape=jax.ShapeDtypeStruct((1, b_pad), x.dtype),
        grid_spec=pltpu.PrefetchScalarGridSpec(
            num_scalar_prefetch=0,
            grid=grid,
            in_specs=[
                pl.BlockSpec((1, tb_eff), lambda i: (0, i)),            # x
                pl.BlockSpec((PACK_ROWS, PACK_COLS), lambda i: (0, 0)),  # params
            ],
            out_specs=pl.BlockSpec((1, tb_eff), lambda i: (0, i)),
        ),
        compiler_params=pltpu.CompilerParams(
            dimension_semantics=("parallel",)),
    )(xt, pack)

    return out_t[0, :B].reshape(B, 1)


# ---------------------------------------------------------------------------
# Deterministic parameter init (mimics nn.Linear default init).
# ---------------------------------------------------------------------------
def init_params(key):
    params = []
    for (fan_in, fan_out) in DIMS:
        key, kw, kb = jax.random.split(key, 3)
        bound = 1.0 / jnp.sqrt(jnp.float32(fan_in))
        w = jax.random.uniform(kw, (fan_in, fan_out), jnp.float32, -bound, bound)
        b = jax.random.uniform(kb, (1, fan_out), jnp.float32, -bound, bound)
        params.append((w, b))
    return params


def reference_forward(x, params):
    h = x
    for idx, (w, b) in enumerate(params):
        h = jnp.matmul(h, w, precision=jax.lax.Precision.HIGHEST) + b
        if idx not in (3, 7):          # no ReLU after encoder / decoder output
            h = jnp.maximum(h, 0.0)
    return h


if __name__ == "__main__":
    key = jax.random.PRNGKey(0)
    k_params, k_x1, k_x2 = jax.random.split(key, 3)

    params = init_params(k_params)

    # Moderate batch: two 512-wide lane-dense tiles (grid length 2).
    B = 1024
    x = jax.random.normal(k_x1, (B, 1), dtype=jnp.float32)
    out = jax.block_until_ready(bombaclat_forward(x, params, tb=512))
    ref = reference_forward(x, params)
    assert out.shape == (B, 1)
    assert jnp.allclose(out, ref, atol=1e-4, rtol=1e-4), "mismatch (B=1024)"

    # Small / ragged batch exercises the lane-padding path.
    B2 = 10
    x2 = jax.random.normal(k_x2, (B2, 1), dtype=jnp.float32)
    out2 = jax.block_until_ready(bombaclat_forward(x2, params))
    ref2 = reference_forward(x2, params)
    assert out2.shape == (B2, 1)
    assert jnp.allclose(out2, ref2, atol=1e-4, rtol=1e-4), "mismatch (B=10)"

    print("KERNEL_OK")
</pallas_src>

<mosaic_0001>
module attributes {stable_mosaic.version = 11 : i64} {
  func.func @bombaclat_kernel(%arg0: i32, %arg1: memref<1x512xf32, #tpu.memory_space<vmem>>, %arg2: memref<160x128xf32, #tpu.memory_space<vmem>>, %arg3: memref<1x512xf32, #tpu.memory_space<vmem>>) attributes {dimension_semantics = [#tpu.dimension_semantics<parallel>], iteration_bounds = array<i64: 2>, scalar_prefetch = 0 : i64, scratch_operands = 0 : i64, tpu.core_type = #tpu.core_type<tc>, window_params = [{transform_indices = @transform_0, window_bounds = array<i64: 1, 512>}, {pipeline_mode = #tpu.pipeline_mode<synchronous>, transform_indices = @transform_1, window_bounds = array<i64: 160, 128>}, {transform_indices = @transform_2, window_bounds = array<i64: 1, 512>}]} {
    %c0 = arith.constant 0 : index
    %c0_0 = arith.constant 0 : index
    %0 = vector.load %arg1[%c0, %c0_0] : memref<1x512xf32, #tpu.memory_space<vmem>>, vector<1x512xf32>
    %c0_1 = arith.constant 0 : index
    %c0_2 = arith.constant 0 : index
    %1 = vector.load %arg2[%c0_1, %c0_2] : memref<160x128xf32, #tpu.memory_space<vmem>>, vector<32x1xf32>
    %c0_3 = arith.constant 0 : index
    %c32 = arith.constant 32 : index
    %2 = vector.load %arg2[%c0_3, %c32] : memref<160x128xf32, #tpu.memory_space<vmem>>, vector<32x1xf32>
    %3 = vector.broadcast %1 : vector<32x1xf32> to vector<32x512xf32>
    %4 = vector.broadcast %0 : vector<1x512xf32> to vector<32x512xf32>
    %5 = arith.mulf %3, %4 : vector<32x512xf32>
    %6 = vector.broadcast %2 : vector<32x1xf32> to vector<32x512xf32>
    %7 = arith.addf %5, %6 : vector<32x512xf32>
    %cst = arith.constant 0.000000e+00 : f32
    %8 = vector.broadcast %cst : f32 to vector<32x512xf32>
    %9 = arith.maximumf %7, %8 : vector<32x512xf32>
    %c32_4 = arith.constant 32 : index
    %c0_5 = arith.constant 0 : index
    %10 = vector.load %arg2[%c32_4, %c0_5] : memref<160x128xf32, #tpu.memory_space<vmem>>, vector<16x32xf32>
    %c32_6 = arith.constant 32 : index
    %c32_7 = arith.constant 32 : index
    %11 = vector.load %arg2[%c32_6, %c32_7] : memref<160x128xf32, #tpu.memory_space<vmem>>, vector<16x1xf32>
    %cst_8 = arith.constant dense<0.000000e+00> : vector<16x512xf32>
    %12 = tpu.matmul %10, %9, %cst_8 {dimension_numbers = #tpu.dot_dimension_numbers<[1], [0], [0], [1], [0, 0, 1, 1], [], []>} : vector<16x32xf32>, vector<32x512xf32>, vector<16x512xf32> -> vector<16x512xf32>
    %13 = vector.broadcast %11 : vector<16x1xf32> to vector<16x512xf32>
    %14 = arith.addf %12, %13 : vector<16x512xf32>
    %cst_9 = arith.constant 0.000000e+00 : f32
    %15 = vector.broadcast %cst_9 : f32 to vector<16x512xf32>
    %16 = arith.maximumf %14, %15 : vector<16x512xf32>
    %c48 = arith.constant 48 : index
    %c0_10 = arith.constant 0 : index
    %17 = vector.load %arg2[%c48, %c0_10] : memref<160x128xf32, #tpu.memory_space<vmem>>, vector<8x16xf32>
    %c48_11 = arith.constant 48 : index
    %c32_12 = arith.constant 32 : index
    %18 = vector.load %arg2[%c48_11, %c32_12] : memref<160x128xf32, #tpu.memory_space<vmem>>, vector<8x1xf32>
    %cst_13 = arith.constant dense<0.000000e+00> : vector<8x512xf32>
    %19 = tpu.matmul %17, %16, %cst_13 {dimension_numbers = #tpu.dot_dimension_numbers<[1], [0], [0], [1], [0, 0, 1, 1], [], []>} : vector<8x16xf32>, vector<16x512xf32>, vector<8x512xf32> -> vector<8x512xf32>
    %20 = vector.broadcast %18 : vector<8x1xf32> to vector<8x512xf32>
    %21 = arith.addf %19, %20 : vector<8x512xf32>
    %cst_14 = arith.constant 0.000000e+00 : f32
    %22 = vector.broadcast %cst_14 : f32 to vector<8x512xf32>
    %23 = arith.maximumf %21, %22 : vector<8x512xf32>
    %c56 = arith.constant 56 : index
    %c0_15 = arith.constant 0 : index
    %24 = vector.load %arg2[%c56, %c0_15] : memref<160x128xf32, #tpu.memory_space<vmem>>, vector<4x8xf32>
    %c56_16 = arith.constant 56 : index
    %c32_17 = arith.constant 32 : index
    %25 = vector.load %arg2[%c56_16, %c32_17] : memref<160x128xf32, #tpu.memory_space<vmem>>, vector<4x1xf32>
    %cst_18 = arith.constant dense<0.000000e+00> : vector<4x512xf32>
    %26 = tpu.matmul %24, %23, %cst_18 {dimension_numbers = #tpu.dot_dimension_numbers<[1], [0], [0], [1], [0, 0, 1, 1], [], []>} : vector<4x8xf32>, vector<8x512xf32>, vector<4x512xf32> -> vector<4x512xf32>
    %27 = vector.broadcast %25 : vector<4x1xf32> to vector<4x512xf32>
    %28 = arith.addf %26, %27 : vector<4x512xf32>
    %c64 = arith.constant 64 : index
    %c0_19 = arith.constant 0 : index
    %29 = vector.load %arg2[%c64, %c0_19] : memref<160x128xf32, #tpu.memory_space<vmem>>, vector<8x4xf32>
    %c64_20 = arith.constant 64 : index
    %c32_21 = arith.constant 32 : index
    %30 = vector.load %arg2[%c64_20, %c32_21] : memref<160x128xf32, #tpu.memory_space<vmem>>, vector<8x1xf32>
    %cst_22 = arith.constant dense<0.000000e+00> : vector<8x512xf32>
    %31 = tpu.matmul %29, %28, %cst_22 {dimension_numbers = #tpu.dot_dimension_numbers<[1], [0], [0], [1], [0, 0, 1, 1], [], []>} : vector<8x4xf32>, vector<4x512xf32>, vector<8x512xf32> -> vector<8x512xf32>
    %32 = vector.broadcast %30 : vector<8x1xf32> to vector<8x512xf32>
    %33 = arith.addf %31, %32 : vector<8x512xf32>
    %cst_23 = arith.constant 0.000000e+00 : f32
    %34 = vector.broadcast %cst_23 : f32 to vector<8x512xf32>
    %35 = arith.maximumf %33, %34 : vector<8x512xf32>
    %c72 = arith.constant 72 : index
    %c0_24 = arith.constant 0 : index
    %36 = vector.load %arg2[%c72, %c0_24] : memref<160x128xf32, #tpu.memory_space<vmem>>, vector<16x8xf32>
    %c72_25 = arith.constant 72 : index
    %c32_26 = arith.constant 32 : index
    %37 = vector.load %arg2[%c72_25, %c32_26] : memref<160x128xf32, #tpu.memory_space<vmem>>, vector<16x1xf32>
    %cst_27 = arith.constant dense<0.000000e+00> : vector<16x512xf32>
    %38 = tpu.matmul %36, %35, %cst_27 {dimension_numbers = #tpu.dot_dimension_numbers<[1], [0], [0], [1], [0, 0, 1, 1], [], []>} : vector<16x8xf32>, vector<8x512xf32>, vector<16x512xf32> -> vector<16x512xf32>
    %39 = vector.broadcast %37 : vector<16x1xf32> to vector<16x512xf32>
    %40 = arith.addf %38, %39 : vector<16x512xf32>
    %cst_28 = arith.constant 0.000000e+00 : f32
    %41 = vector.broadcast %cst_28 : f32 to vector<16x512xf32>
    %42 = arith.maximumf %40, %41 : vector<16x512xf32>
    %c88 = arith.constant 88 : index
    %c0_29 = arith.constant 0 : index
    %43 = vector.load %arg2[%c88, %c0_29] : memref<160x128xf32, #tpu.memory_space<vmem>>, vector<32x16xf32>
    %c88_30 = arith.constant 88 : index
    %c32_31 = arith.constant 32 : index
    %44 = vector.load %arg2[%c88_30, %c32_31] : memref<160x128xf32, #tpu.memory_space<vmem>>, vector<32x1xf32>
    %cst_32 = arith.constant dense<0.000000e+00> : vector<32x512xf32>
    %45 = tpu.matmul %43, %42, %cst_32 {dimension_numbers = #tpu.dot_dimension_numbers<[1], [0], [0], [1], [0, 0, 1, 1], [], []>} : vector<32x16xf32>, vector<16x512xf32>, vector<32x512xf32> -> vector<32x512xf32>
    %46 = vector.broadcast %44 : vector<32x1xf32> to vector<32x512xf32>
    %47 = arith.addf %45, %46 : vector<32x512xf32>
    %cst_33 = arith.constant 0.000000e+00 : f32
    %48 = vector.broadcast %cst_33 : f32 to vector<32x512xf32>
    %49 = arith.maximumf %47, %48 : vector<32x512xf32>
    %c120 = arith.constant 120 : index
    %c0_34 = arith.constant 0 : index
    %50 = vector.load %arg2[%c120, %c0_34] : memref<160x128xf32, #tpu.memory_space<vmem>>, vector<32x1xf32>
    %c152 = arith.constant 152 : index
    %c0_35 = arith.constant 0 : index
    %51 = vector.load %arg2[%c152, %c0_35] : memref<160x128xf32, #tpu.memory_space<vmem>>, vector<1x1xf32>
    %52 = vector.broadcast %50 : vector<32x1xf32> to vector<32x512xf32>
    %53 = arith.mulf %52, %49 : vector<32x512xf32>
    %cst_36 = arith.constant dense<0.000000e+00> : vector<512xf32>
    %54 = vector.multi_reduction <add>, %53, %cst_36 [0] : vector<32x512xf32> to vector<512xf32>
    %55 = vector.shape_cast %54 : vector<512xf32> to vector<1x512xf32>
    %56 = vector.broadcast %51 : vector<1x1xf32> to vector<1x512xf32>
    %57 = arith.addf %55, %56 : vector<1x512xf32>
    %c0_37 = arith.constant 0 : index
    %c0_38 = arith.constant 0 : index
    %58 = vector.load %arg3[%c0_37, %c0_38] : memref<1x512xf32, #tpu.memory_space<vmem>>, vector<1x512xf32>
    tpu.vector_store %arg3[%c0_37, %c0_38], %57 {strides = array<i32>} : memref<1x512xf32, #tpu.memory_space<vmem>>, vector<1x512xf32>,
    return
  }
  func.func @transform_0(%arg0: i32) -> (i32, i32) {
    %c0_i32 = arith.constant 0 : i32
    %c0_i32_0 = arith.constant 0 : i32
    return %c0_i32, %arg0 : i32, i32
  }
  func.func @transform_1(%arg0: i32) -> (i32, i32) {
    %c0_i32 = arith.constant 0 : i32
    %c0_i32_0 = arith.constant 0 : i32
    %c0_i32_1 = arith.constant 0 : i32
    return %c0_i32, %c0_i32_0 : i32, i32
  }
  func.func @transform_2(%arg0: i32) -> (i32, i32) {
    %c0_i32 = arith.constant 0 : i32
    %c0_i32_0 = arith.constant 0 : i32
    return %c0_i32, %arg0 : i32, i32
  }
}

</mosaic_0001>

<bundles_post_ra>
// kernel: tpu_custom_call.1
= control target key start
LH: loop header
LB: loop body
LE: loop exit
PB: predicated region body
PF: predicated region fallthrough
CT: control target
= control target key end

     0   :  { %7 = vsyncpa [#allocation3], 0  ;;  %s2084_s0 = inlined_call_operand.hbm [shape: f32[1,1024], index: 0, kind: input, shape index: {}]   ;;  %s2085_s1 = inlined_call_operand.hbm [shape: f32[160,128], index: 1, kind: input, shape index: {}]   ;;  %s2086_s2 = inlined_call_operand.hbm [shape: f32[1,1024], index: 2, kind: output, shape index: {}]  }
   0x1   :  { %9 = vsyncpa [#allocation3 + $0x1], 0 }
   0x2   :  { %10 = vsyncpa [#allocation6], 0 }
   0x3   :  { %11 = vsyncpa [#allocation4], 0 }
   0x4   :  { %13 = vsyncpa [#allocation4 + $0x1], 0  ;;  %s1821_s9 = smov 0   ;;  %s1823_s10 = smov 0  }
   0x5   :  { %s1825_s11 = smov 0   ;;  %s1827_s12 = smov 0  }
   0x6 LB: > { %s1842_s13 = sadd.s32 4294967295, %s1795_s12   ;;  %s1559_s14 = sadd.s32 4294967294, %s1795_s12   ;;  %s1795_s12 = sphi %s1827_s12, %s2108_s12   ;;  %s1791_s11 = sphi %s1825_s11, %s2107_s11   ;;  %s1787_s10 = sphi %s1823_s10, %s2106_s10   ;;  %s1783_s9 = sphi %s1821_s9, %s2105_s9  }
   0x7   : > { %p39_p0 = scmp.ne.s32.totalorder %s1787_s10, %s1783_s9  ;;  %p2087_p1 = scmp.eq.s32.totalorder %s1842_s13, 0 }
   0x8   : > { %p90_p3 = scmp.eq.s32.totalorder %s1559_s14, 1  ;;  %p1560_p5 = scmp.ge.s32.totalorder %s1795_s12, 1 }
   0x9   : > { %p1851_p4 = por %p2087_p1, %p39_p0  ;;  %p97_p7 = scmp.lt.s32.totalorder %s1795_s12, 3 }
   0xa   : > { %p1856_p6 = por %p90_p3, %p39_p0  ;;  %s1797_s18 = smov [#allocation5]  }
   0xb   : > { %s2091_s15 = scalar_select %p1851_p4, 1, 0 }
   0xc   : > { %s2092_s16 = scalar_select %p1856_p6, 1, 0 }
   0xd   : > { %p1861_p8 = pnand %p1560_p5, %p97_p7  ;;  %s109_s19 = sshll.u32 %s1797_s18, 4  ;;  %s110_s19 = int_to_ptr.vmem [resolvable:$true] %s109_s19 }
   0xe   : > { %s1875_s21 = sadd.s32 1, %s1795_s12   ;;  %s26_s22 = sadd.s32 1, %s1791_s11 }
   0xf   : > { %s2093_s17 = scalar_select %p1861_p8, 1, 0 }
  0x10   : > { %p1611_p9 = pneg %p1861_p8  ;;  %s23_s23 = ssub.s32 %s1795_s12, %s1875_s21 }
  0x11   : > { %s1684_s24 = scalar_lea.vmem %s110_s19, 2560  ;;  %p1692_p5 = scmp.lt.s32.totalorder %s110_s19, %s110_s19 }
  0x12   : > { %p1870_p11 = pnand %p1611_p9, %p2087_p1  ;;  %p1685_p13 = scmp.ne.s32.totalorder %s110_s19, %s1684_s24 }
  0x13   : > { %p1693_p7 = scmp.lt.s32.totalorder %s1684_s24, %s1684_s24 }
  0x14   : > { %p1675_p12 = pneg %p1870_p11 }
  0x15   : > { %p1694_p10 = por %p1693_p7, %p1692_p5 }
  0x16   : > { %p1687_p0 = pnand %p1685_p13, %p1675_p12 }
  0x18   : > { %p1688_p3 = pneg %p1687_p0 }
  0x1a   : > { %p1695_p2 = pnand %p1694_p10, %p1688_p3 }
  0x1c   : > { %1698 = shalt.err (!%p1695_p2)
}
  0x1d   : > { %s1798_s25 = smov 128   ;;  %s1799_s26 = smov 8  }
  0x1e   : > { %1614 = dma.hbm_to_vmem [thread:$0]  (!%p1870_p11), %s2085_s1, 2560, %s110_s19, [#allocation6], %s1798_s25, %s1798_s25, %s1799_s26  }
  0x1f   : > { %p24_p9 = scmp.eq.s32.totalorder %s23_s23, 0  ;;  %p33_p12 = scmp.ne.s32.totalorder %s1791_s11, %s1787_s10 }
  0x20   : > { %p34_p10 = scmp.eq.s32.totalorder %s1795_s12, 0  ;;  %p1624_p2 = scmp.lt.s32.totalorder %s1795_s12, 2 }
  0x21   : > { %s1892_s29 = scalar_select %p24_p9, %s1791_s11, %s26_s22  }
  0x22   : > { %p35_p13 = por %p34_p10, %p33_p12  ;;  %p2095_p0 = scmp.eq.s32.totalorder %s1842_s13, 1 }
  0x23   : > { %s123_s3 = sand.u32 1, %s1791_s11   ;;  %s1601_s4 = sshll.u32 %s1795_s12, 6 }
  0x24   : > { %p1896_p3 = por %p2095_p0, %p33_p12  ;;  %s1563_s5 = sshll.u32 %s123_s3, 2 }
  0x25   : > { %s1905_s8 = scalar_lea.hbm %s2084_s0, %s1601_s4  ;;  %s127_s14 = scalar_lea.vmem [#allocation2], %s1563_s5 }
  0x26   : > { %s2096_s30 = scalar_select %p1896_p3, 1, 0 }
  0x27   : > { %s135_s18 = sshll.u32 %s127_s14, 4  ;;  %p1907_p11 = pnand %p1624_p2, %p35_p13  ;;  %s136_s18 = int_to_ptr.vmem [resolvable:$true] %s135_s18 }
  0x28   : > { %s124_s20 = scalar_lea.sflag [#allocation3], %s123_s3  ;;  %s1699_s22 = scalar_lea.hbm %s1905_s8, 64 }
  0x29   : > { %p1700_p5 = scmp.ne.s32.totalorder %s1905_s8, %s1699_s22  ;;  %p1701_p7 = pneg %p1907_p11 }
  0x2a   : > { %s1704_s25 = scalar_lea.hbm %s2084_s0, 128  ;;  %p1705_p10 = scmp.lt.s32.totalorder %s1905_s8, %s2084_s0 }
  0x2b   : > { %p1702_p9 = pnand %p1701_p7, %p1700_p5  ;;  %p1706_p2 = scmp.lt.s32.totalorder %s1704_s25, %s1699_s22 }
  0x2d   : > { %p1703_p12 = pneg %p1702_p9  ;;  %p1707_p13 = por %p1706_p2, %p1705_p10 }
  0x2f   : > { %p1708_p0 = pnand %p1707_p13, %p1703_p12 }
  0x31   : > { %1711 = shalt.err (!%p1708_p0)
}
  0x32   : > { %s1712_s28 = scalar_lea.vmem %s136_s18, 64  ;;  %s1800_s3 = smov [#allocation2]  }
  0x33   : > { %p1713_p1 = scmp.ne.s32.totalorder %s136_s18, %s1712_s28  ;;  %s1717_s4 = sshll.u32 %s1800_s3, 4  ;;  %s1718_s4 = int_to_ptr.vmem [resolvable:$false] %s1717_s4 }
  0x34   : > { %s1719_s5 = scalar_lea.vmem %s1718_s4, 128  ;;  %p1720_p5 = scmp.lt.s32.totalorder %s136_s18, %s1718_s4 }
  0x35   : > { %p1715_p6 = pnand %p1713_p1, %p1701_p7  ;;  %p1721_p9 = scmp.lt.s32.totalorder %s1719_s5, %s1712_s28 }
  0x37   : > { %p1716_p3 = pneg %p1715_p6  ;;  %p1722_p4 = por %p1721_p9, %p1720_p5 }
  0x39   : > { %p1723_p8 = pnand %p1722_p4, %p1716_p3 }
  0x3b   : > { %1726 = shalt.err (!%p1723_p8)
}
  0x3c   : > { %1618 = dma.hbm_to_vmem [thread:$0]  (!%p1907_p11), %s1905_s8, 64, %s136_s18, %s124_s20  }
  0x3d   : > { %p2098_p12 = scmp.ne.s32.totalorder %s2093_s17, 0 }
  0x3e   : > { %s1928_s6 = sand.u32 (!%p2098_p12), 1, %s1787_s10   ;;  %p2099_p1 = scmp.ne.s32.totalorder (!%p2098_p12), %s2091_s15, 0 }
  0x3f   : > { %144 = sbr.rel (%p2098_p12) target bundleno = 1485 (0x5cd), region = 28  ;;  %s1567_s7 = sshll.u32 (!%p2098_p12), %s1928_s6, 2 }
  0x40   : > { %s147_s14 = scalar_lea.sflag (!%p2098_p12), [#allocation3], %s1928_s6  ;;  %s1934_s22 = scalar_lea.vmem (!%p2098_p12), [#allocation2], %s1567_s7 }
  0x44   : > { %1770 = dma.done.wait (%p2099_p1), %s147_s14, 64  }
  0x45   : > { %1772 = vsyncadd (%p2099_p1), %s147_s14, 4294967232  ;;  %p2100_p4 = scmp.eq.s32.totalorder %s1842_s13, 0 }
  0x47   : > { %1774 = dma.done.wait (%p2100_p4), [#allocation6], 2560   ;;  %p2101_p6 = pmov %p2100_p4 }
  0x48   : > { %v1801_v0 = vmov 32   ;;  %v1802_v1 = vmov 0   ;;  %v181_v2 = vld [vmem:[#allocation5 + $0x18] sm:$0xff]  ;;  %v180_v3 = vld [vmem:[#allocation5 + $0x10] sm:$0xff]  ;;  %v179_v4 = vld [vmem:[#allocation5 + $0x8] sm:$0xff]  ;;  %v1803_v8 = vmov 0.0   ;;  %v203_v18 = vlaneseq }
  0x49   : > { %1776 = vsyncadd (%p2101_p6), [#allocation6], 4294964736  ;;  %1667 = vset.pattern.permute.xlu1 %v1801_v0  ;;  %1666 = vset.pattern.permute.xlu0 %v1802_v1  ;;  %v178_v5 = vld [vmem:[#allocation5] sm:$0xff]  ;;  %v1946_v7 = vld [vmem:[#allocation5 + $0x28] sm:$0xff]  ;;  %vm299_vm0 = vcmask 261120   ;;  %vm472_vm1 = vcmask 130048  }
  0x4a   : > { %252 = vperm.xlu1 %1667, %v181_v2   ;;  %199 = vperm.xlu0 %1666, %v181_v2   ;;  %v1944_v6 = vld [vmem:[#allocation5 + $0x20] sm:$0xff]  ;;  %v1951_v9 = vld [vmem:[#allocation5 + $0x38] sm:$0xf]  ;;  %v1954_v10 = vld [vmem:[#allocation5 + $0x30] sm:$0xff]  ;;  %v1980_v19 = vshrl.u32 %v203_v18, 7  ;;  %vm627_vm2 = vcmask 64512  }
  0x4b   : > { %368 = vmatprep.mubr.f32.mxu0 %v1803_v8  ;;  %445 = vmatprep.mubr.f32.mxu1 %v1803_v8  ;;  %v1958_v11 = vld [vmem:[#allocation5 + $0x50] sm:$0xff]  ;;  %v1960_v12 = vld [vmem:[#allocation5 + $0x40] sm:$0xff]  ;;  %v1964_v13 = vld [vmem:[#allocation5 + $0x58] sm:$0xff]  ;;  %vm781_vm3 = vcmask 1043456   ;;  %vm778_vm4 = vcmask 31744   ;;  %s1602_s15 = sshll.u32 %s1842_s13, 6 }
  0x4c   : > { %v1966_v14 = vld [vmem:[#allocation5 + $0x48] sm:$0xff]  ;;  %v1972_v16 = vld [vmem:[#allocation5 + $0x60] sm:$0xff]  ;;  %v1976_v17 = vld [vmem:[#allocation5 + $0x70] sm:$0xff]  ;;  %v205_v20 = vsub.s32 0, %v1980_v19  ;;  %v209_v21 = vsub.s32 1, %v1980_v19  ;;  %v213_v22 = vsub.s32 2, %v1980_v19  ;;  %s1477_s20 = scalar_lea.hbm %s2086_s2, %s1602_s15 }
  0x4d   : > { %v1970_v15 = vld [vmem:[#allocation5 + $0x68] sm:$0xff]  ;;  %v217_v23 = vsub.s32 3, %v1980_v19  ;;  %v177_v24 = vld [vmem:[%s1934_s22] sm:$0xf]  ;;  %s174_s17 = scalar_lea.vmem [#allocation7], %s1567_s7  ;;  %vm1461_vm5 = vcmp.lt.s32.totalorder %v203_v18, 512 }
  0x4e   : > { %1668 = vset.pattern.permute.xlu1 %v1802_v1  ;;  %194 = vperm.xlu0 %1666, %v180_v3   ;;  %v206_v25 = vrot.slane %v177_v24, %v205_v20  ;;  %v210_v26 = vrot.slane %v177_v24, %v209_v21  ;;  %v214_v27 = vrot.slane %v177_v24, %v213_v22  ;;  %s1479_s8 = sshll.u32 %s174_s17, 4  ;;  %s1465_s23 = scalar_lea.sflag [#allocation4], %s1928_s6  ;;  %s1480_s8 = int_to_ptr.vmem [resolvable:$true] %s1479_s8 }
  0x4f   : > { %189 = vperm.xlu1 %1668, %v179_v4   ;;  %v218_v28 = vrot.slane %v177_v24, %v217_v23  ;;  %s1727_s24 = scalar_lea.vmem %s1480_s8, 64  ;;  %p2102_p3 = scmp.ne.s32.totalorder %s2096_s30, 0 }
  0x50   : > { %p1728_p8 = scmp.ne.s32.totalorder %s1480_s8, %s1727_s24  ;;  %s1805_s13 = smov [#allocation7]  }
  0x51   : > { %s1731_s25 = sshll.u32 %s1805_s13, 4  ;;  %s1732_s25 = int_to_ptr.vmem [resolvable:$false] %s1731_s25 }
  0x52   : > { %1669 = vset.pattern.permute.xlu0 %v1801_v0  ;;  %p1729_p11 = pnand %p1728_p8, %p2102_p3  ;;  %s1733_s26 = scalar_lea.vmem %s1732_s25, 128 }
  0x53   : > { %248 = vperm.xlu0 %1669, %v180_v3   ;;  %184 = vperm.xlu1 %1668, %v178_v5   ;;  %p1734_p10 = scmp.lt.s32.totalorder %s1480_s8, %s1732_s25  ;;  %p1735_p2 = scmp.lt.s32.totalorder %s1733_s26, %s1727_s24 }
  0x54   : > { %p1730_p7 = pneg %p1729_p11 }
  0x55   : > { %p1736_p13 = por %p1735_p2, %p1734_p10 }
  0x57   : > { %240 = vperm.xlu0 %1669, %v178_v5   ;;  %1670 = vset.pattern.permute.xlu1 %v1801_v0  ;;  %p1737_p0 = pnand %p1736_p13, %p1730_p7 }
  0x58   : > { %244 = vperm.xlu1 %1670, %v179_v4  }
  0x5b   : > { %291 = vperm.xlu0 %1669, %v1944_v6  }
  0x5c   : > { %296 = vperm.xlu1 %1670, %v1946_v7  }
  0x5f   : > { %624 = vperm.xlu0 %1669, %v1951_v9  }
  0x60   : > { %469 = vperm.xlu1 %1670, %v1954_v10  }
  0x63   : > { %949 = vperm.xlu0 %1669, %v1958_v11  }
  0x64   : > { %775 = vperm.xlu1 %1670, %v1960_v12  }
  0x67   : > { %1124 = vperm.xlu0 %1669, %v1964_v13  }
  0x68   : > { %944 = vperm.xlu1 %1670, %v1966_v14  }
  0x6b   : > { %1134 = vperm.xlu0 %1669, %v1970_v15  }
  0x6c   : > { %1129 = vperm.xlu1 %1670, %v1972_v16  }
  0x6f   : > { %1671 = vset.pattern.permute.xlu0 %v1802_v1 }
  0x70   : > { %1139 = vperm.xlu1 %1670, %v1976_v17  }
  0x74   : > { %1672 = vset.pattern.permute.xlu1 %v1802_v1 }
  0xc5   : > { %v253_v29 = vpop.permute.xlu1 %252  ;;  %v200_v30 = vpop.permute.xlu0 %199 }
  0xc6   : > { %v236_v31 = vmul.f32 %v210_v26, %v200_v30  ;;  %v238_v32 = vmul.f32 %v218_v28, %v200_v30  ;;  %v235_v33 = vmul.f32 %v206_v25, %v200_v30  ;;  %v237_v34 = vmul.f32 %v214_v27, %v200_v30 }
  0xc8   : > { %v268_v35 = vadd.f32 %v253_v29, %v236_v31  ;;  %v270_v36 = vadd.f32 %v253_v29, %v238_v32  ;;  %v267_v37 = vadd.f32 %v253_v29, %v235_v33  ;;  %v269_v38 = vadd.f32 %v253_v29, %v237_v34 }
  0xc9   : > { %v195_v39 = vpop.permute.xlu0 %194 }
  0xca   : > { %v190_v40 = vpop.permute.xlu1 %189  ;;  %v284_v41 = vmax.f32 %v268_v35, 0.0  ;;  %v286_v42 = vmax.f32 %v270_v36, 0.0  ;;  %v283_v43 = vmax.f32 %v267_v37, 0.0  ;;  %v285_v44 = vmax.f32 %v269_v38, 0.0 }
  0xcb   : > { %v231_v45 = vmul.f32 %v206_v25, %v195_v39  ;;  %v232_v46 = vmul.f32 %v210_v26, %v195_v39  ;;  %v234_v47 = vmul.f32 %v218_v28, %v195_v39  ;;  %v233_v50 = vmul.f32 %v214_v27, %v195_v39 }
  0xcc   : > { %328 = vmatprep.subr.mxu0 %v284_v41  ;;  %405 = vmatprep.subr.mxu1 %v286_v42  ;;  %v227_v51 = vmul.f32 %v206_v25, %v190_v40  ;;  %v228_v52 = vmul.f32 %v210_v26, %v190_v40  ;;  %v229_v53 = vmul.f32 %v214_v27, %v190_v40 }
  0xcd   : > { %329 = vmatpush1.msra.mxu0 %v283_v43  ;;  %406 = vmatpush1.msra.mxu1 %v285_v44  ;;  %v230_v57 = vmul.f32 %v218_v28, %v190_v40 }
  0xce   : > { %v249_v48 = vpop.permute.xlu0 %248  ;;  %v185_v49 = vpop.permute.xlu1 %184 }
  0xcf   : > { %v264_v54 = vadd.f32 %v249_v48, %v232_v46  ;;  %v266_v55 = vadd.f32 %v249_v48, %v234_v47  ;;  %v263_v56 = vadd.f32 %v249_v48, %v231_v45  ;;  %v224_v58 = vmul.f32 %v210_v26, %v185_v49 }
  0xd0   : > { %v226_v59 = vmul.f32 %v218_v28, %v185_v49  ;;  %v265_v60 = vadd.f32 %v249_v48, %v233_v50  ;;  %v223_v61 = vmul.f32 %v206_v25, %v185_v49  ;;  %v225_v2 = vmul.f32 %v214_v27, %v185_v49 }
  0xd1   : > { %v280_v63 = vmax.f32 %v264_v54, 0.0  ;;  %v282_v0 = vmax.f32 %v266_v55, 0.0  ;;  %v279_v1 = vmax.f32 %v263_v56, 0.0 }
  0xd2   : > { %v241_v62 = vpop.permute.xlu0 %240  ;;  %v281_v4 = vmax.f32 %v265_v60, 0.0 }
  0xd3   : > { %v245_v3 = vpop.permute.xlu1 %244  ;;  %v256_v5 = vadd.f32 %v241_v62, %v224_v58  ;;  %v258_v20 = vadd.f32 %v241_v62, %v226_v59  ;;  %330 = vmatprep.subr.mxu0 %v280_v63  ;;  %407 = vmatprep.subr.mxu1 %v282_v0  ;;  %v255_v26 = vadd.f32 %v241_v62, %v223_v61 }
  0xd4   : > { %v260_v21 = vadd.f32 %v245_v3, %v228_v52  ;;  %v262_v22 = vadd.f32 %v245_v3, %v230_v57  ;;  %v259_v23 = vadd.f32 %v245_v3, %v227_v51  ;;  %331 = vmatpush1.msra.mxu0 %v279_v1  ;;  %408 = vmatpush1.msra.mxu1 %v281_v4 }
  0xd5   : > { %v261_v24 = vadd.f32 %v245_v3, %v229_v53  ;;  %v257_v30 = vadd.f32 %v241_v62, %v225_v2  ;;  %v272_v27 = vmax.f32 %v256_v5, 0.0  ;;  %v274_v32 = vmax.f32 %v258_v20, 0.0 }
  0xd6   : > { %v276_v28 = vmax.f32 %v260_v21, 0.0  ;;  %v278_v25 = vmax.f32 %v262_v22, 0.0  ;;  %v275_v29 = vmax.f32 %v259_v23, 0.0  ;;  %v271_v33 = vmax.f32 %v255_v26, 0.0  ;;  %v292_v41 = vpop.permute.xlu0 %291 }
  0xd7   : > { %v277_v31 = vmax.f32 %v261_v24, 0.0  ;;  %v273_v34 = vmax.f32 %v257_v30, 0.0 }
  0xd8   : > { %332 = vmatprep.subr.mxu0 %v276_v28  ;;  %409 = vmatprep.subr.mxu1 %v278_v25 }
  0xd9   : > { %333 = vmatpush1.msra.mxu0 %v275_v29  ;;  %410 = vmatpush1.msra.mxu1 %v277_v31 }
  0xda   : > { %334 = vmatprep.subr.mxu0 %v272_v27  ;;  %411 = vmatprep.subr.mxu1 %v274_v32  ;;  %v625_v23 = vpop.permute.xlu0 %624 }
  0xdb   : > { %335 = vmatpush1.msra.mxu0 %v271_v33  ;;  %412 = vmatpush1.msra.mxu1 %v273_v34 }
  0xdc   : > { %1570 = vmatmul.mubr.msk.f32.vlgmr.msra.gmra.mxu0 %vm299_vm0, %v1944_v6  ;;  %1572 = vmatmul.mubr.msk.f32.vlgmr.msra.gmra.mxu1 %vm299_vm0, %v1944_v6  ;;  %v297_v6 = vpop.permute.xlu1 %296 }
  0xdd   : > { %374 = vmatprep.mubr.f32.mxu0 %v1803_v8  ;;  %451 = vmatprep.mubr.f32.mxu1 %v1803_v8 }
  0xe0   : > { %1571 = vmatmul.mubr.msk.f32.gmra.mxu0 %vm299_vm0, %v1946_v7  ;;  %1573 = vmatmul.mubr.msk.f32.gmra.mxu1 %vm299_vm0, %v1946_v7  ;;  %v470_v61 = vpop.permute.xlu1 %469 }
  0xe1   : > { %539 = vmatprep.mubr.f32.mxu0 %v1803_v8  ;;  %610 = vmatprep.mubr.f32.mxu1 %v1803_v8 }
  0xe4   : > { %v776_v27 = vpop.permute.xlu1 %775 }
 0x19c   : > { %v370_v35 = vpop.f32.mrf.mxu0  ;;  %v447_v36 = vpop.f32.mrf.mxu1 }
 0x19d   : > { %v371_v49 = vadd.f32 %v370_v35, %v292_v41  ;;  %v448_v50 = vadd.f32 %v447_v36, %v292_v41 }
 0x19e   : > { %v372_v37 = vpop.f32.mrf.mxu0  ;;  %v449_v38 = vpop.f32.mrf.mxu1 }
 0x19f   : > { %v373_v46 = vadd.f32 %v372_v37, %v292_v41  ;;  %v450_v47 = vadd.f32 %v449_v38, %v292_v41  ;;  %v458_v57 = vmax.f32 %v371_v49, 0.0  ;;  %v460_v58 = vmax.f32 %v448_v50, 0.0  ;;  %v945_v49 = vpop.permute.xlu1 %944 }
 0x1a0   : > { %v376_v39 = vpop.f32.mrf.mxu0  ;;  %v453_v40 = vpop.f32.mrf.mxu1 }
 0x1a1   : > { %v377_v42 = vadd.f32 %v376_v39, %v297_v6  ;;  %v454_v43 = vadd.f32 %v453_v40, %v297_v6  ;;  %v459_v55 = vmax.f32 %v373_v46, 0.0  ;;  %v461_v56 = vmax.f32 %v450_v47, 0.0 }
 0x1a2   : > { %v378_v44 = vpop.f32.mrf.mxu0  ;;  %v455_v45 = vpop.f32.mrf.mxu1 }
 0x1a3   : > { %v379_v48 = vadd.f32 %v378_v44, %v297_v6  ;;  %v456_v7 = vadd.f32 %v455_v45, %v297_v6  ;;  %v462_v53 = vmax.f32 %v377_v42, 0.0  ;;  %v464_v54 = vmax.f32 %v454_v43, 0.0  ;;  %v1345_v6 = vld [vmem:[#allocation5 + $0x80] sm:$0xff]  ;;  %v1346_v42 = vld [vmem:[#allocation5 + $0x88] sm:$0xff]  ;;  %v1348_v43 = vld [vmem:[#allocation5 + $0x98] sm:$0x1] }
 0x1a4   : > { %1356 = vperm.xlu1 %1672, %v1345_v6  }
 0x1a5   : > { %v463_v51 = vmax.f32 %v379_v48, 0.0  ;;  %v465_v52 = vmax.f32 %v456_v7, 0.0  ;;  %v950_v7 = vpop.permute.xlu0 %949 }
 0x1a7   : > { %503 = vmatprep.subr.mxu0 %v463_v51  ;;  %574 = vmatprep.subr.mxu1 %v465_v52 }
 0x1a8   : > { %504 = vmatpush1.msra.mxu0 %v462_v53  ;;  %575 = vmatpush1.msra.mxu1 %v464_v54 }
 0x1a9   : > { %505 = vmatprep.subr.mxu0 %v459_v55  ;;  %576 = vmatprep.subr.mxu1 %v461_v56 }
 0x1aa   : > { %506 = vmatpush1.msra.mxu0 %v458_v57  ;;  %577 = vmatpush1.msra.mxu1 %v460_v58 }
 0x1ab   : > { %1574 = vmatmul.mubr.msk.f32.vlgmr.msra.gmra.mxu0 %vm472_vm1, %v1954_v10  ;;  %1575 = vmatmul.mubr.msk.f32.vlgmr.msra.gmra.mxu1 %vm472_vm1, %v1954_v10 }
 0x1ac   : > { %694 = vmatprep.mubr.f32.mxu0 %v1803_v8  ;;  %765 = vmatprep.mubr.f32.mxu1 %v1803_v8 }
 0x1ad   : > { %1361 = vperm.xlu1 %1672, %v1346_v42  }
 0x1b1   : > { %1423 = vperm.xlu1 %1672, %v1348_v43  }
 0x26b   : > { %v541_v59 = vpop.f32.mrf.mxu0  ;;  %v612_v60 = vpop.f32.mrf.mxu1 }
 0x26c   : > { %v542_v62 = vadd.f32 %v541_v59, %v470_v61  ;;  %v613_v63 = vadd.f32 %v612_v60, %v470_v61 }
 0x26d   : > { %v543_v0 = vpop.f32.mrf.mxu0  ;;  %v614_v1 = vpop.f32.mrf.mxu1 }
 0x26e   : > { %v544_v2 = vadd.f32 %v543_v0, %v470_v61  ;;  %v615_v3 = vadd.f32 %v614_v1, %v470_v61  ;;  %v617_v20 = vmax.f32 %v542_v62, 0.0  ;;  %v619_v21 = vmax.f32 %v613_v63, 0.0 }
 0x270   : > { %v618_v4 = vmax.f32 %v544_v2, 0.0  ;;  %v620_v5 = vmax.f32 %v615_v3, 0.0 }
 0x272   : > { %660 = vmatprep.subr.mxu0 %v618_v4  ;;  %731 = vmatprep.subr.mxu1 %v620_v5 }
 0x273   : > { %661 = vmatpush1.msra.mxu0 %v617_v20  ;;  %732 = vmatpush1.msra.mxu1 %v619_v21 }
 0x274   : > { %1576 = vmatmul.mubr.msk.f32.vlgmr.msra.gmra.mxu0 %vm627_vm2, %v1951_v9  ;;  %1577 = vmatmul.mubr.msk.f32.vlgmr.msra.gmra.mxu1 %vm627_vm2, %v1951_v9 }
 0x275   : > { %858 = vmatprep.mubr.f32.mxu0 %v1803_v8  ;;  %929 = vmatprep.mubr.f32.mxu1 %v1803_v8 }
 0x334   : > { %v696_v10 = vpop.f32.mrf.mxu0  ;;  %v767_v22 = vpop.f32.mrf.mxu1 }
 0x335   : > { %v697_v29 = vadd.f32 %v696_v10, %v625_v23  ;;  %v768_v30 = vadd.f32 %v767_v22, %v625_v23 }
 0x336   : > { %v698_v24 = vpop.f32.mrf.mxu0  ;;  %v769_v26 = vpop.f32.mrf.mxu1 }
 0x337   : > { %v699_v28 = vadd.f32 %v698_v24, %v625_v23  ;;  %v770_v25 = vadd.f32 %v769_v26, %v625_v23 }
 0x339   : > { %1578 = vmatprep.subr.msk.mxu0 %vm781_vm3, %v699_v28  ;;  %1581 = vmatprep.subr.msk.mxu1 %vm781_vm3, %v770_v25 }
 0x33a   : > { %1579 = vmatpush1.msk.msra.mxu0 %vm781_vm3, %v697_v29  ;;  %1582 = vmatpush1.msk.msra.mxu1 %vm781_vm3, %v768_v30 }
 0x33b   : > { %1580 = vmatmul.mubr.msk.f32.vlgmr.msra.gmra.mxu0 %vm778_vm4, %v1960_v12  ;;  %1583 = vmatmul.mubr.msk.f32.vlgmr.msra.gmra.mxu1 %vm778_vm4, %v1960_v12  ;;  %v1344_v12 = vld [vmem:[#allocation5 + $0x78] sm:$0xff] }
 0x33c   : > { %1020 = vmatprep.mubr.f32.mxu0 %v1803_v8  ;;  %1097 = vmatprep.mubr.f32.mxu1 %v1803_v8 }
 0x33d   : > { %1351 = vperm.xlu0 %1671, %v1344_v12  }
 0x3fb   : > { %v860_v9 = vpop.f32.mrf.mxu0  ;;  %v931_v31 = vpop.f32.mrf.mxu1 }
 0x3fc   : > { %v861_v32 = vadd.f32 %v860_v9, %v776_v27  ;;  %v932_v33 = vadd.f32 %v931_v31, %v776_v27 }
 0x3fd   : > { %v862_v34 = vpop.f32.mrf.mxu0  ;;  %v933_v35 = vpop.f32.mrf.mxu1 }
 0x3fe   : > { %v863_v36 = vadd.f32 %v862_v34, %v776_v27  ;;  %v934_v37 = vadd.f32 %v933_v35, %v776_v27  ;;  %v936_v40 = vmax.f32 %v861_v32, 0.0  ;;  %v938_v41 = vmax.f32 %v932_v33, 0.0 }
 0x400   : > { %v937_v38 = vmax.f32 %v863_v36, 0.0  ;;  %v939_v39 = vmax.f32 %v934_v37, 0.0 }
 0x402   : > { %986 = vmatprep.subr.mxu0 %v937_v38  ;;  %1063 = vmatprep.subr.mxu1 %v939_v39 }
 0x403   : > { %987 = vmatpush1.msra.mxu0 %v936_v40  ;;  %1064 = vmatpush1.msra.mxu1 %v938_v41 }
 0x404   : > { %1584 = vmatmul.mubr.msk.f32.vlgmr.msra.gmra.mxu0 %vm627_vm2, %v1966_v14  ;;  %1586 = vmatmul.mubr.msk.f32.vlgmr.msra.gmra.mxu1 %vm627_vm2, %v1966_v14  ;;  %v1347_v14 = vld [vmem:[#allocation5 + $0x90] sm:$0xff] }
 0x405   : > { %1026 = vmatprep.mubr.f32.mxu0 %v1803_v8  ;;  %1103 = vmatprep.mubr.f32.mxu1 %v1803_v8 }
 0x406   : > { %1366 = vperm.xlu0 %1671, %v1347_v14  }
 0x408   : > { %1585 = vmatmul.mubr.msk.f32.gmra.mxu0 %vm627_vm2, %v1958_v11  ;;  %1587 = vmatmul.mubr.msk.f32.gmra.mxu1 %vm627_vm2, %v1958_v11 }
 0x409   : > { %1214 = vmatprep.mubr.f32.mxu0 %v1803_v8  ;;  %1303 = vmatprep.mubr.f32.mxu1 %v1803_v8 }
 0x4c4   : > { %v1022_v44 = vpop.f32.mrf.mxu0  ;;  %v1099_v45 = vpop.f32.mrf.mxu1 }
 0x4c5   : > { %v1023_v58 = vadd.f32 %v1022_v44, %v945_v49  ;;  %v1100_v59 = vadd.f32 %v1099_v45, %v945_v49 }
 0x4c6   : > { %v1024_v46 = vpop.f32.mrf.mxu0  ;;  %v1101_v47 = vpop.f32.mrf.mxu1 }
 0x4c7   : > { %v1025_v54 = vadd.f32 %v1024_v46, %v945_v49  ;;  %v1102_v55 = vadd.f32 %v1101_v47, %v945_v49  ;;  %v1110_v2 = vmax.f32 %v1023_v58, 0.0  ;;  %v1112_v3 = vmax.f32 %v1100_v59, 0.0 }
 0x4c8   : > { %v1028_v48 = vpop.f32.mrf.mxu0  ;;  %v1105_v11 = vpop.f32.mrf.mxu1 }
 0x4c9   : > { %v1029_v50 = vadd.f32 %v1028_v48, %v950_v7  ;;  %v1106_v51 = vadd.f32 %v1105_v11, %v950_v7  ;;  %v1111_v0 = vmax.f32 %v1025_v54, 0.0  ;;  %v1113_v1 = vmax.f32 %v1102_v55, 0.0 }
 0x4ca   : > { %v1030_v52 = vpop.f32.mrf.mxu0  ;;  %v1107_v53 = vpop.f32.mrf.mxu1 }
 0x4cb   : > { %v1031_v56 = vadd.f32 %v1030_v52, %v950_v7  ;;  %v1108_v57 = vadd.f32 %v1107_v53, %v950_v7  ;;  %v1114_v62 = vmax.f32 %v1029_v50, 0.0  ;;  %v1116_v63 = vmax.f32 %v1106_v51, 0.0 }
 0x4cd   : > { %v1115_v60 = vmax.f32 %v1031_v56, 0.0  ;;  %v1117_v61 = vmax.f32 %v1108_v57, 0.0 }
 0x4cf   : > { %1178 = vmatprep.subr.mxu0 %v1115_v60  ;;  %1267 = vmatprep.subr.mxu1 %v1117_v61 }
 0x4d0   : > { %1179 = vmatpush1.msra.mxu0 %v1114_v62  ;;  %1268 = vmatpush1.msra.mxu1 %v1116_v63 }
 0x4d1   : > { %1180 = vmatprep.subr.mxu0 %v1111_v0  ;;  %1269 = vmatprep.subr.mxu1 %v1113_v1 }
 0x4d2   : > { %1181 = vmatpush1.msra.mxu0 %v1110_v2  ;;  %1270 = vmatpush1.msra.mxu1 %v1112_v3 }
 0x4d3   : > { %1588 = vmatmul.mubr.msk.f32.vlgmr.msra.gmra.mxu0 %vm472_vm1, %v1964_v13  ;;  %1592 = vmatmul.mubr.msk.f32.vlgmr.msra.gmra.mxu1 %vm472_vm1, %v1964_v13  ;;  %v1130_v13 = vpop.permute.xlu1 %1129 }
 0x4d4   : > { %1220 = vmatprep.mubr.f32.mxu0 %v1803_v8  ;;  %1309 = vmatprep.mubr.f32.mxu1 %v1803_v8 }
 0x4d7   : > { %1589 = vmatmul.mubr.msk.f32.gmra.mxu0 %vm472_vm1, %v1972_v16  ;;  %1593 = vmatmul.mubr.msk.f32.gmra.mxu1 %vm472_vm1, %v1972_v16  ;;  %v1125_v16 = vpop.permute.xlu0 %1124  ;;  %v1140_v20 = vpop.permute.xlu1 %1139 }
 0x4d8   : > { %1226 = vmatprep.mubr.f32.mxu0 %v1803_v8  ;;  %1315 = vmatprep.mubr.f32.mxu1 %v1803_v8 }
 0x4db   : > { %1590 = vmatmul.mubr.msk.f32.gmra.mxu0 %vm472_vm1, %v1970_v15  ;;  %1594 = vmatmul.mubr.msk.f32.gmra.mxu1 %vm472_vm1, %v1970_v15  ;;  %v1135_v15 = vpop.permute.xlu0 %1134  ;;  %v1357_v25 = vpop.permute.xlu1 %1356 }
 0x4dc   : > { %1232 = vmatprep.mubr.f32.mxu0 %v1803_v8  ;;  %1321 = vmatprep.mubr.f32.mxu1 %v1803_v8 }
 0x4df   : > { %1591 = vmatmul.mubr.msk.f32.gmra.mxu0 %vm472_vm1, %v1976_v17  ;;  %1595 = vmatmul.mubr.msk.f32.gmra.mxu1 %vm472_vm1, %v1976_v17  ;;  %v1352_v32 = vpop.permute.xlu0 %1351  ;;  %v1362_v7 = vpop.permute.xlu1 %1361 }
 0x593   : > { %v1216_v4 = vpop.f32.mrf.mxu0  ;;  %v1305_v5 = vpop.f32.mrf.mxu1 }
 0x594   : > { %v1217_v21 = vadd.f32 %v1216_v4, %v1125_v16  ;;  %v1306_v10 = vadd.f32 %v1305_v5, %v1125_v16 }
 0x595   : > { %v1218_v22 = vpop.f32.mrf.mxu0  ;;  %v1307_v23 = vpop.f32.mrf.mxu1 }
 0x596   : > { %v1219_v24 = vadd.f32 %v1218_v22, %v1125_v16  ;;  %v1308_v26 = vadd.f32 %v1307_v23, %v1125_v16  ;;  %v1328_v29 = vmax.f32 %v1217_v21, 0.0  ;;  %v1330_v30 = vmax.f32 %v1306_v10, 0.0 }
 0x597   : > { %v1222_v28 = vpop.f32.mrf.mxu0  ;;  %v1311_v8 = vpop.f32.mrf.mxu1 }
 0x598   : > { %v1223_v9 = vadd.f32 %v1222_v28, %v1130_v13  ;;  %v1312_v31 = vadd.f32 %v1311_v8, %v1130_v13  ;;  %v1329_v35 = vmax.f32 %v1219_v24, 0.0  ;;  %v1331_v36 = vmax.f32 %v1308_v26, 0.0  ;;  %v1367_v24 = vpop.permute.xlu0 %1366 }
 0x599   : > { %v1224_v17 = vpop.f32.mrf.mxu0  ;;  %v1313_v27 = vpop.f32.mrf.mxu1  ;;  %v1369_v14 = vmul.f32 %v1352_v32, %v1328_v29  ;;  %v1371_v43 = vmul.f32 %v1352_v32, %v1330_v30 }
 0x59a   : > { %v1225_v33 = vadd.f32 %v1224_v17, %v1130_v13  ;;  %v1314_v34 = vadd.f32 %v1313_v27, %v1130_v13  ;;  %v1332_v37 = vmax.f32 %v1223_v9, 0.0  ;;  %v1334_v38 = vmax.f32 %v1312_v31, 0.0 }
 0x59b   : > { %v1228_v39 = vpop.f32.mrf.mxu0  ;;  %v1317_v40 = vpop.f32.mrf.mxu1  ;;  %v1370_v49 = vmul.f32 %v1352_v32, %v1329_v35  ;;  %v1372_v50 = vmul.f32 %v1352_v32, %v1331_v36 }
 0x59c   : > { %v1333_v41 = vmax.f32 %v1225_v33, 0.0  ;;  %v1335_v12 = vmax.f32 %v1314_v34, 0.0  ;;  %v1229_v6 = vadd.f32 %v1228_v39, %v1135_v15  ;;  %v1318_v42 = vadd.f32 %v1317_v40, %v1135_v15 }
 0x59d   : > { %v1230_v44 = vpop.f32.mrf.mxu0  ;;  %v1319_v45 = vpop.f32.mrf.mxu1  ;;  %v1373_v46 = vmul.f32 %v1357_v25, %v1332_v37  ;;  %v1375_v47 = vmul.f32 %v1357_v25, %v1334_v38 }
 0x59e   : > { %v1336_v48 = vmax.f32 %v1229_v6, 0.0  ;;  %v1338_v11 = vmax.f32 %v1318_v42, 0.0  ;;  %v1231_v51 = vadd.f32 %v1230_v44, %v1135_v15  ;;  %v1320_v52 = vadd.f32 %v1319_v45, %v1135_v15 }
 0x59f   : > { %v1234_v53 = vpop.f32.mrf.mxu0  ;;  %v1323_v54 = vpop.f32.mrf.mxu1  ;;  %v1374_v55 = vmul.f32 %v1357_v25, %v1333_v41  ;;  %v1376_v56 = vmul.f32 %v1357_v25, %v1335_v12  ;;  %v1385_v1 = vadd.f32 %v1373_v46, %v1369_v14  ;;  %v1403_v2 = vadd.f32 %v1375_v47, %v1371_v43 }
 0x5a0   : > { %v1377_v57 = vmul.f32 %v1362_v7, %v1336_v48  ;;  %v1379_v58 = vmul.f32 %v1362_v7, %v1338_v11  ;;  %v1337_v59 = vmax.f32 %v1231_v51, 0.0  ;;  %v1339_v60 = vmax.f32 %v1320_v52, 0.0 }
 0x5a1   : > { %v1235_v61 = vadd.f32 %v1234_v53, %v1140_v20  ;;  %v1324_v62 = vadd.f32 %v1323_v54, %v1140_v20  ;;  %v1236_v63 = vpop.f32.mrf.mxu0  ;;  %v1325_v0 = vpop.f32.mrf.mxu1  ;;  %v1394_v10 = vadd.f32 %v1374_v55, %v1370_v49  ;;  %v1412_v22 = vadd.f32 %v1376_v56, %v1372_v50 }
 0x5a2   : > { %v1237_v3 = vadd.f32 %v1236_v63, %v1140_v20  ;;  %v1326_v13 = vadd.f32 %v1325_v0, %v1140_v20  ;;  %v1378_v16 = vmul.f32 %v1362_v7, %v1337_v59  ;;  %v1380_v4 = vmul.f32 %v1362_v7, %v1339_v60  ;;  %v1424_v56 = vpop.permute.xlu1 %1423 }
 0x5a3   : > { %v1340_v5 = vmax.f32 %v1235_v61, 0.0  ;;  %v1342_v21 = vmax.f32 %v1324_v62, 0.0  ;;  %v1386_v8 = vadd.f32 %v1385_v1, %v1377_v57  ;;  %v1404_v25 = vadd.f32 %v1403_v2, %v1379_v58 }
 0x5a4   : > { %v1341_v23 = vmax.f32 %v1237_v3, 0.0  ;;  %v1343_v15 = vmax.f32 %v1326_v13, 0.0  ;;  %v1395_v9 = vadd.f32 %v1394_v10, %v1378_v16  ;;  %v1413_v31 = vadd.f32 %v1412_v22, %v1380_v4 }
 0x5a5   : > { %v1381_v26 = vmul.f32 %v1367_v24, %v1340_v5  ;;  %v1383_v28 = vmul.f32 %v1367_v24, %v1342_v21  ;;  %v1804_v41 = vmov 1966171168  }
 0x5a6   : > { %v1382_v29 = vmul.f32 %v1367_v24, %v1341_v23  ;;  %v1384_v30 = vmul.f32 %v1367_v24, %v1343_v15  ;;  %v1437_v12 = vunpack.c.l.s4 %v1804_v41 }
 0x5a7   : > { %v1387_v17 = vadd.f32 %v1386_v8, %v1381_v26  ;;  %v1405_v27 = vadd.f32 %v1404_v25, %v1383_v28 }
 0x5a8   : > { %v1396_v20 = vadd.f32 %v1395_v9, %v1382_v29  ;;  %v1414_v32 = vadd.f32 %v1413_v31, %v1384_v30  ;;  %v1438_v48 = vunpack.c.0.s8 %v1437_v12 }
 0x5a9   : > { %v1388_v33 = vrot.slane %v1387_v17, 4  ;;  %v1406_v34 = vrot.slane %v1405_v27, 4 }
 0x5aa   : > { %v1397_v35 = vrot.slane %v1396_v20, 4  ;;  %v1415_v36 = vrot.slane %v1414_v32, 4  ;;  %v1441_v55 = vsub.s32 %v1438_v48, %v1980_v19 }
 0x5ab   : > { %v1389_v37 = vadd.f32 %v1388_v33, %v1387_v17  ;;  %v1407_v38 = vadd.f32 %v1406_v34, %v1405_v27 }
 0x5ac   : > { %v1398_v39 = vadd.f32 %v1397_v35, %v1396_v20  ;;  %v1416_v40 = vadd.f32 %v1415_v36, %v1414_v32 }
 0x5ad   : > { %v1390_v6 = vrot.slane %v1389_v37, 2  ;;  %v1408_v42 = vrot.slane %v1407_v38, 2 }
 0x5ae   : > { %v1399_v14 = vrot.slane %v1398_v39, 2  ;;  %v1417_v43 = vrot.slane %v1416_v40, 2 }
 0x5af   : > { %v1391_v44 = vadd.f32 %v1390_v6, %v1389_v37  ;;  %v1409_v45 = vadd.f32 %v1408_v42, %v1407_v38 }
 0x5b0   : > { %v1400_v46 = vadd.f32 %v1399_v14, %v1398_v39  ;;  %v1418_v47 = vadd.f32 %v1417_v43, %v1416_v40 }
 0x5b1   : > { %v1392_v11 = vrot.slane %v1391_v44, 1  ;;  %v1410_v7 = vrot.slane %v1409_v45, 1 }
 0x5b2   : > { %v1401_v49 = vrot.slane %v1400_v46, 1  ;;  %v1419_v50 = vrot.slane %v1418_v47, 1 }
 0x5b3   : > { %v1393_v51 = vadd.f32 %v1392_v11, %v1391_v44  ;;  %v1411_v52 = vadd.f32 %v1410_v7, %v1409_v45 }
 0x5b4   : > { %v1402_v53 = vadd.f32 %v1401_v49, %v1400_v46  ;;  %v1420_v54 = vadd.f32 %v1419_v50, %v1418_v47 }
 0x5b5   : > { %v1426_v57 = vadd.f32 %v1424_v56, %v1393_v51  ;;  %v1428_v59 = vadd.f32 %v1424_v56, %v1411_v52 }
 0x5b6   : > { %v1427_v58 = vadd.f32 %v1424_v56, %v1402_v53  ;;  %v1429_v60 = vadd.f32 %v1424_v56, %v1420_v54 }
 0x5b8   : > { %v1434_v61 = vcombine.low %v1426_v57, %v1427_v58  ;;  %v1435_v62 = vcombine.low %v1428_v59, %v1429_v60 }
 0x5ba   : > { %v1442_v63 = vrot.slane %v1434_v61, %v1441_v55  ;;  %v1449_v0 = vrot.slane %v1435_v62, %v1441_v55 }
 0x5bc   : > { %v1450_v1 = vcombine.low %v1442_v63, %v1449_v0 }
 0x5be   : > { %v1457_v2 = vrot.slane %v1450_v1, %v1441_v55 }
 0x5c0   : > { %1463 = vst.msk [vmem:[%s174_s17] sm:$0xf] %vm1461_vm5, %v1457_v2 }
 0x5c1   : > { %1740 = shalt.err (!%p1737_p0)
}
 0x5c2   : > { %s1741_s27 = scalar_lea.hbm %s1477_s20, 64  ;;  %s1745_s4 = scalar_lea.hbm %s2086_s2, 128 }
 0x5c3   : > { %p1742_p5 = scmp.ne.s32.totalorder %s1477_s20, %s1741_s27  ;;  %p1746_p1 = scmp.lt.s32.totalorder %s1477_s20, %s2086_s2 }
 0x5c4   : > { %p1747_p4 = scmp.lt.s32.totalorder %s1745_s4, %s1741_s27 }
 0x5c5   : > { %p1743_p9 = pnand %p1742_p5, %p2102_p3 }
 0x5c6   : > { %p1748_p6 = por %p1747_p4, %p1746_p1 }
 0x5c7   : > { %p1744_p12 = pneg %p1743_p9 }
 0x5c9   : > { %p1749_p8 = pnand %p1748_p6, %p1744_p12 }
 0x5cb   : > { %1752 = shalt.err (!%p1749_p8)
}
 0x5cc   : > { %1609 = dma.vmem_to_hbm [thread:$0]  (%p2102_p3), %s1480_s8, 64, %s1477_s20, %s1465_s23  }
 0x5cd PF: > { %s1491_s7 = sand.u32 1, %s1783_s9   ;;  %p2103_p11 = scmp.ne.s32.totalorder %s2092_s16, 0 }
 0x5ce   : > { %p2104_p7 = scmp.ge.s32.totalorder %s1795_s12, 2  ;;  %s1492_s14 = scalar_lea.sflag [#allocation4], %s1491_s7 }
 0x5d0   : > { %p1620_p10 = pnand %p2104_p7, %p2103_p11 }
 0x5d2   : > { %p1621_p2 = pneg %p1620_p10 }
 0x5d4   : > { %1778 = dma.done.wait (%p1621_p2), %s1492_s14, 64  }
 0x5d5   : > { %1780 = vsyncadd (%p1621_p2), %s1492_s14, 4294967232  ;;  %p16_p13 = scmp.ge.s32.totalorder %s1875_s21, 4   ;;  %s2105_s9 = smov %s1787_s10 }
 0x5d6   : > { %s2106_s10 = smov %s1791_s11  ;;  %s2107_s11 = smov %s1892_s29 }
 0x5d7   : > { %s2108_s12 = smov %s1875_s21  ;;  %18 = sbr.rel (!%p16_p13) target bundleno = 6 (0x6), region = 77 }
 0x5dc   :  { %1497 = vsyncpa [#allocation3], 1 }
 0x5dd   :  { %1499 = vsyncpa [#allocation3 + $0x1], 1 }
 0x5de   :  { %1500 = vsyncpa [#allocation6], 1 }
 0x5df   :  { %1501 = vsyncpa [#allocation4], 1 }
 0x5e0   :  { %1503 = vsyncpa [#allocation4 + $0x1], 1 }

</bundles_post_ra>
